<compile_context>
chip_gen: v7x
topology: tpu7x:2x2x1
jax: 0.10.0
libtpu: 0.0.40
codegen_flags: <defaults>
</compile_context>

<pallas_src>
import functools

import jax
import jax.numpy as jnp
from jax import lax
from jax.experimental import pallas as pl
from jax.experimental.pallas import tpu as pltpu

EPS = 1e-8
_LANE = 128
# Below this total size a fused XLA elementwise beats a 1-step Pallas grid.
_MIN_PALLAS_BYTES = 256 * 1024


def _vmem_config():
    """(block_budget_bytes, vmem_limit_bytes) sized per TPU generation."""
    phys = 64 * 1024 * 1024                      # conservative default (v7x)
    try:
        phys = int(pltpu.get_tpu_info().vmem_capacity_bytes) or phys
    except Exception:
        pass
    # Scoped limit: leave headroom under physical VMEM
    # (48 MiB on v7x's 64 MiB; 64 MiB on v5e/v6e's 128 MiB).
    vmem_limit = min(phys * 3 // 4, 64 * 1024 * 1024)
    # Double-buffered in+out (~4x block) plus kernel temporaries must fit the
    # scoped limit -> budget blocks at limit/8, capped at 8 MiB.
    block_budget = min(vmem_limit // 8, 8 * 1024 * 1024)
    return block_budget, vmem_limit


def _round_down(v, m):
    return max(m, (v // m) * m)


def _pixel_norm_xla(x):
    xf = x.astype(jnp.float32)
    ms = jnp.mean(xf * xf, axis=1, keepdims=True)
    return (xf * lax.rsqrt(ms + EPS)).astype(x.dtype)


def _pixelnorm_kernel(x_ref, o_ref, *, inv_c):
    # Block: (bn, C, T); channel reduction over axis=1.
    x = x_ref[...].astype(jnp.float32)
    ms = jnp.sum(x * x, axis=1, keepdims=True) * inv_c   # (bn, 1, T)
    inv = lax.rsqrt(ms + EPS)                            # EUP, row only
    o_ref[...] = (x * inv).astype(o_ref.dtype)           # VALU broadcast mul


def pixel_norm(x, *, block_budget_bytes=None):
    """x: (N, C, H, W) array. Returns PixelNorm(x) with same shape/dtype."""
    n, c, h, w = x.shape
    hw = h * w
    itemsize = jnp.dtype(x.dtype).itemsize
    total_bytes = n * c * hw * itemsize

    # Tiny tensors: a 1-step Pallas grid has zero DMA/compute overlap and
    # idles one v7x TensorCore; let XLA fuse it with neighbouring ops.
    if total_bytes < _MIN_PALLAS_BYTES:
        return _pixel_norm_xla(x)

    block_budget, vmem_limit = _vmem_config()
    if block_budget_bytes is not None:
        block_budget = block_budget_bytes
    if itemsize < 4:
        # In-kernel f32 accumulation inflates the working set for narrow
        # dtypes; shrink the byte budget so the f32 footprint stays similar.
        block_budget = max(_LANE * c * itemsize, block_budget * itemsize // 4)

    per_image_bytes = c * hw * itemsize
    x3 = x.reshape(n, c, hw)                   # contiguous view, no HBM pass
    kernel = functools.partial(_pixelnorm_kernel, inv_c=1.0 / c)

    if per_image_bytes <= block_budget:
        # Whole-image blocks; pack several images per block up to the budget.
        # Each block is one contiguous DMA.  (Also used for HW < 128: stores
        # are masked/narrow, but no extra transpose pass over HBM is paid.)
        bn = max(1, min(n, block_budget // per_image_bytes))
        if n >= 2:
            bn = min(bn, max(1, n // 2))       # keep >= 2 blocks for megacore
        while n % bn:                          # exact leading-dim tiling
            bn -= 1
        grid = (n // bn,)
        in_spec = pl.BlockSpec((bn, c, hw), lambda i: (i, 0, 0))
        out_spec = pl.BlockSpec((bn, c, hw), lambda i: (i, 0, 0))
        dims = ("parallel",)
    elif hw >= _LANE:
        # A single image exceeds the budget: tile the lane (HW) axis with the
        # largest 128-multiple tile the budget allows; ragged tail accepted.
        t_hw = _round_down(
            min(hw, max(_LANE, block_budget // (c * itemsize))), _LANE)
        if n * pl.cdiv(hw, t_hw) < 2 and t_hw >= 2 * _LANE:
            t_hw = _round_down((t_hw + 1) // 2, _LANE)   # >= 2 blocks (v7x)
        grid = (n, pl.cdiv(hw, t_hw))
        in_spec = pl.BlockSpec((1, c, t_hw), lambda i, j: (i, 0, j))
        out_spec = pl.BlockSpec((1, c, t_hw), lambda i, j: (i, 0, j))
        dims = ("parallel", "parallel")
    else:
        # HW < 128 and one image slab doesn't fit VMEM: no lane-dense tiling
        # is possible without an extra transpose pass; leave it to XLA.
        return _pixel_norm_xla(x)

    out = pl.pallas_call(
        kernel,
        out_shape=jax.ShapeDtypeStruct((n, c, hw), x.dtype),
        grid_spec=pltpu.PrefetchScalarGridSpec(
            num_scalar_prefetch=0,
            grid=grid,
            in_specs=[in_spec],
            out_specs=out_spec,
        ),
        compiler_params=pltpu.CompilerParams(
            dimension_semantics=dims,
            vmem_limit_bytes=vmem_limit,
        ),
    )(x3)
    return out.reshape(n, c, h, w)


def _reference(x):
    xf = x.astype(jnp.float32)
    return xf / jnp.sqrt(jnp.mean(xf * xf, axis=1, keepdims=True) + EPS)


if __name__ == "__main__":
    key = jax.random.PRNGKey(0)
    k0, k1, k2, k3 = jax.random.split(key, 4)

    # 1) Spec shape (2,4,16,16): tiny -> fused XLA fallback path.
    x0 = jax.random.normal(k0, (2, 4, 16, 16), dtype=jnp.float32)
    y0 = jax.block_until_ready(pixel_norm(x0))
    assert y0.shape == x0.shape and y0.dtype == x0.dtype
    assert jnp.allclose(y0, _reference(x0), atol=1e-5, rtol=1e-5), "fallback mismatch"

    # 2) Whole-image Pallas path (per-image slab fits the budget), f32.
    x1 = jax.random.normal(k1, (2, 8, 92, 92), dtype=jnp.float32)
    y1 = jax.block_until_ready(pixel_norm(x1))
    assert y1.shape == x1.shape and y1.dtype == x1.dtype
    assert jnp.allclose(y1, _reference(x1), atol=1e-5, rtol=1e-5), "whole-image mismatch"

    # 3) Lane-tiled Pallas path with a ragged tail block (force it with a
    #    small block budget so the test tensor stays small): HW = 8464,
    #    t_hw = 4096 -> grid (2, 3), last HW block masked on writeback.
    y1b = jax.block_until_ready(pixel_norm(x1, block_budget_bytes=128 * 1024))
    assert jnp.allclose(y1b, _reference(x1), atol=1e-5, rtol=1e-5), "ragged-tile mismatch"

    # 4) HW < 128 deep-layer style shape, big enough to take the Pallas
    #    whole-image path (narrow masked stores, zero transpose passes).
    x2 = jax.random.normal(k2, (4, 256, 8, 8), dtype=jnp.float32)
    y2 = jax.block_until_ready(pixel_norm(x2))
    assert y2.shape == x2.shape and y2.dtype == x2.dtype
    assert jnp.allclose(y2, _reference(x2), atol=1e-5, rtol=1e-5), "hw<128 mismatch"

    # 5) bf16 input through the Pallas path (f32 accumulation inside).
    x3 = jax.random.normal(k3, (2, 8, 92, 92), dtype=jnp.bfloat16)
    y3 = jax.block_until_ready(pixel_norm(x3))
    assert y3.shape == x3.shape and y3.dtype == x3.dtype
    assert jnp.allclose(y3.astype(jnp.float32), _reference(x3),
                        atol=5e-2, rtol=5e-2), "bf16 mismatch"

    print("KERNEL_OK")
</pallas_src>

<mosaic_0001>
module attributes {stable_mosaic.version = 11 : i64} {
  func.func @_pixelnorm_kernel(%arg0: i32, %arg1: memref<1x8x8464xf32, #tpu.memory_space<vmem>>, %arg2: memref<1x8x8464xf32, #tpu.memory_space<vmem>>) attributes {dimension_semantics = [#tpu.dimension_semantics<parallel>], iteration_bounds = array<i64: 2>, scalar_prefetch = 0 : i64, scratch_operands = 0 : i64, tpu.core_type = #tpu.core_type<tc>, window_params = [{transform_indices = @transform_0, window_bounds = array<i64: 1, 8, 8464>}, {transform_indices = @transform_1, window_bounds = array<i64: 1, 8, 8464>}]} {
    %c0 = arith.constant 0 : index
    %c0_0 = arith.constant 0 : index
    %c0_1 = arith.constant 0 : index
    %0 = vector.load %arg1[%c0, %c0_0, %c0_1] : memref<1x8x8464xf32, #tpu.memory_space<vmem>>, vector<1x8x8464xf32>
    %1 = arith.mulf %0, %0 : vector<1x8x8464xf32>
    %cst = arith.constant dense<0.000000e+00> : vector<1x8464xf32>
    %2 = vector.multi_reduction <add>, %1, %cst [1] : vector<1x8x8464xf32> to vector<1x8464xf32>
    %3 = vector.shape_cast %2 : vector<1x8464xf32> to vector<1x1x8464xf32>
    %cst_2 = arith.constant 1.250000e-01 : f32
    %4 = vector.broadcast %cst_2 : f32 to vector<1x1x8464xf32>
    %5 = arith.mulf %3, %4 : vector<1x1x8464xf32>
    %cst_3 = arith.constant 9.99999993E-9 : f32
    %6 = vector.broadcast %cst_3 : f32 to vector<1x1x8464xf32>
    %7 = arith.addf %5, %6 : vector<1x1x8464xf32>
    %8 = math.rsqrt %7 : vector<1x1x8464xf32>
    %9 = vector.broadcast %8 : vector<1x1x8464xf32> to vector<1x8x8464xf32>
    %10 = arith.mulf %0, %9 : vector<1x8x8464xf32>
    %c0_4 = arith.constant 0 : index
    %c0_5 = arith.constant 0 : index
    %c0_6 = arith.constant 0 : index
    %11 = vector.load %arg2[%c0_4, %c0_5, %c0_6] : memref<1x8x8464xf32, #tpu.memory_space<vmem>>, vector<1x8x8464xf32>
    tpu.vector_store %arg2[%c0_4, %c0_5, %c0_6], %10 {strides = array<i32>} : memref<1x8x8464xf32, #tpu.memory_space<vmem>>, vector<1x8x8464xf32>,
    return
  }
  func.func @transform_0(%arg0: i32) -> (i32, i32, i32) {
    %c0_i32 = arith.constant 0 : i32
    %c0_i32_0 = arith.constant 0 : i32
    %c0_i32_1 = arith.constant 0 : i32
    return %arg0, %c0_i32, %c0_i32_0 : i32, i32, i32
  }
  func.func @transform_1(%arg0: i32) -> (i32, i32, i32) {
    %c0_i32 = arith.constant 0 : i32
    %c0_i32_0 = arith.constant 0 : i32
    %c0_i32_1 = arith.constant 0 : i32
    return %arg0, %c0_i32, %c0_i32_0 : i32, i32, i32
  }
}

</mosaic_0001>

<bundles_post_ra>
// kernel: tpu_custom_call.1
= control target key start
LH: loop header
LB: loop body
LE: loop exit
PB: predicated region body
PF: predicated region fallthrough
CT: control target
= control target key end

     0   :  { %6 = vsyncpa [#allocation3], 0  ;;  %s2032_s0 = inlined_call_operand.hbm [shape: f32[2,8,8464], index: 0, kind: input, shape index: {}]   ;;  %s2033_s1 = inlined_call_operand.hbm [shape: f32[2,8,8464], index: 1, kind: output, shape index: {}]  }
   0x1   :  { %8 = vsyncpa [#allocation3 + $0x1], 0 }
   0x2   :  { %9 = vsyncpa [#allocation4], 0 }
   0x3   :  { %11 = vsyncpa [#allocation4 + $0x1], 0  ;;  %s1393_s6 = smov 0   ;;  %s1395_s7 = smov 0  }
   0x4   :  { %s1397_s8 = smov 0   ;;  %s1399_s9 = smov 0  }
   0x5 LB: > { %s1414_s10 = sadd.s32 4294967295, %s1379_s9   ;;  %s1091_s11 = sadd.s32 4294967294, %s1379_s9   ;;  %s1379_s9 = sphi %s1399_s9, %s2047_s9   ;;  %s1375_s8 = sphi %s1397_s8, %s2046_s8   ;;  %s1371_s7 = sphi %s1395_s7, %s2045_s7   ;;  %s1367_s6 = sphi %s1393_s6, %s2044_s6  }
   0x6   : > { %s1418_s12 = sadd.s32 1, %s1379_s9   ;;  %s24_s13 = sadd.s32 1, %s1375_s8 }
   0x7   : > { %s21_s14 = ssub.s32 %s1379_s9, %s1418_s12  ;;  %p31_p0 = scmp.ne.s32.totalorder %s1375_s8, %s1371_s7 }
   0x8   : > { %p22_p1 = scmp.eq.s32.totalorder %s21_s14, 0  ;;  %p32_p2 = scmp.eq.s32.totalorder %s1379_s9, 0 }
   0x9   : > { %p37_p3 = scmp.ne.s32.totalorder %s1371_s7, %s1367_s6  ;;  %p38_p4 = scmp.eq.s32.totalorder %s1414_s10, 0 }
   0xa   : > { %s1430_s15 = scalar_select %p22_p1, %s1375_s8, %s24_s13  }
   0xb   : > { %p33_p5 = por %p32_p2, %p31_p0  ;;  %p1432_p6 = por %p38_p4, %p37_p3 }
   0xc   : > { %p61_p7 = scmp.eq.s32.totalorder %s1414_s10, 1  ;;  %p67_p8 = scmp.eq.s32.totalorder %s1091_s11, 1 }
   0xd   : > { %p1115_p10 = scmp.lt.s32.totalorder %s1379_s9, 2  ;;  %s87_s19 = sand.u32 1, %s1375_s8  }
   0xe   : > { %p1439_p11 = por %p61_p7, %p31_p0  ;;  %p1443_p12 = por %p67_p8, %p37_p3 }
   0xf   : > { %s1100_s20 = smul.u32 8576, %s1379_s9  ;;  %p1454_p13 = pnand %p1115_p10, %p33_p5 }
  0x10   : > { %s2036_s17 = scalar_select %p1439_p11, 1, 0 }
  0x11   : > { %s2037_s18 = scalar_select %p1443_p12, 1, 0 }
  0x12   : > { %s1099_s21 = smul.u32 536, %s87_s19  ;;  %s1452_s24 = scalar_lea.hbm %s2032_s0, %s1100_s20 }
  0x13   : > { %s88_s28 = scalar_lea.sflag [#allocation3], %s87_s19  ;;  %s1283_s29 = scalar_lea.hbm %s1452_s24, 8576 }
  0x14   : > { %s91_s26 = scalar_lea.vmem [#allocation2], %s1099_s21  ;;  %p1284_p2 = scmp.ne.s32.totalorder %s1452_s24, %s1283_s29 }
  0x15   : > { %s99_s27 = sshll.u32 %s91_s26, 4  ;;  %p1285_p3 = pneg %p1454_p13  ;;  %s1459_s27 = int_to_ptr.vmem [resolvable:$true] %s99_s27 }
  0x16   : > { %s1288_s3 = scalar_lea.hbm %s2032_s0, 17152  ;;  %p1289_p7 = scmp.lt.u32.totalorder %s1452_s24, %s2032_s0 }
  0x17   : > { %p1286_p4 = pnand %p1285_p3, %p1284_p2  ;;  %p1290_p8 = scmp.lt.u32.totalorder %s1288_s3, %s1283_s29 }
  0x18   : > { %p1292_p9 = scmp.lt.u32.totalorder %s1283_s29, %s1452_s24 }
  0x19   : > { %p1287_p5 = pneg %p1286_p4  ;;  %p1291_p10 = por %p1290_p8, %p1289_p7 }
  0x1b   : > { %p1293_p0 = por %p1292_p9, %p1291_p10 }
  0x1d   : > { %p1294_p1 = pnand %p1293_p0, %p1287_p5 }
  0x1f   : > { %1297 = shalt.err (!%p1294_p1)
}
  0x20   : > { %s1298_s11 = scalar_lea.vmem %s1459_s27, 8576  ;;  %s1381_s13 = smov [#allocation2]  }
  0x21   : > { %p1299_p2 = scmp.ne.s32.totalorder %s1459_s27, %s1298_s11  ;;  %s1303_s14 = sshll.u32 %s1381_s13, 4  ;;  %s1304_s14 = int_to_ptr.vmem [resolvable:$false] %s1303_s14 }
  0x22   : > { %s1305_s19 = scalar_lea.vmem %s1304_s14, 17152  ;;  %p1306_p11 = scmp.lt.s32.totalorder %s1459_s27, %s1304_s14 }
  0x23   : > { %p1301_p4 = pnand %p1299_p2, %p1285_p3  ;;  %p1307_p7 = scmp.lt.s32.totalorder %s1305_s19, %s1298_s11 }
  0x25   : > { %p1302_p12 = pneg %p1301_p4  ;;  %p1308_p8 = por %p1307_p7, %p1306_p11 }
  0x27   : > { %p1309_p9 = pnand %p1308_p8, %p1302_p12 }
  0x29   : > { %1312 = shalt.err (!%p1309_p9)
}
  0x2a   : > { %1110 = dma.hbm_to_vmem [thread:$0]  (!%p1454_p13), %s1452_s24, 8576, %s1459_s27, %s88_s28  }
  0x2b   : > { %p2039_p0 = scmp.lt.s32.totalorder %s1379_s9, 3  ;;  %p2040_p1 = scmp.ge.s32.totalorder %s1379_s9, 1 }
  0x2d   : > { %p105_p3 = pnand %p2040_p1, %p2039_p0 }
  0x2e   : > { %s1492_s20 = sand.u32 (!%p105_p3), 1, %s1371_s7  }
  0x2f   : > { %108 = sbr.rel (%p105_p3) target bundleno = 275 (0x113), region = 24  ;;  %s111_s22 = scalar_lea.sflag (!%p105_p3), [#allocation3], %s1492_s20 }
  0x30   : > { %s1101_s21 = smul.u32 (!%p105_p3), 536, %s1492_s20 }
  0x32   : > { %s1498_s23 = scalar_lea.vmem (!%p105_p3), [#allocation2], %s1101_s21 }
  0x36   : > { %1358 = dma.done.wait (%p1432_p6), %s111_s22, 8576  }
  0x37   : > { %1360 = vsyncadd (%p1432_p6), %s111_s22, 4294958720  ;;  %v1505_v0 = vld [vmem:[%s1498_s23] sm:$0xff]  ;;  %v1508_v1 = vld [vmem:[%s1498_s23 + $0x8] sm:$0xff]  ;;  %s1590_s16 = scalar_lea.vmem [#allocation5], %s1101_s21  ;;  %vm663_vm0 = vcmask 130048   ;;  %s1102_s24 = smul.u32 8576, %s1414_s10 }
  0x38   : > { %v1511_v2 = vld [vmem:[%s1498_s23 + $0x10] sm:$0xff]  ;;  %v200_v3 = vmul.f32 %v1505_v0, %v1505_v0  ;;  %v201_v4 = vmul.f32 %v1508_v1, %v1508_v1  ;;  %v1520_v6 = vld [vmem:[%s1498_s23 + $0x18] sm:$0xff]  ;;  %v1523_v7 = vld [vmem:[%s1498_s23 + $0x20] sm:$0xff]  ;;  %s1021_s25 = sshll.u32 %s1590_s16, 4  ;;  %s1007_s29 = scalar_lea.sflag [#allocation4], %s1492_s20  ;;  %s1988_s25 = int_to_ptr.vmem [resolvable:$true] %s1021_s25 }
  0x39   : > { %v202_v5 = vmul.f32 %v1511_v2, %v1511_v2  ;;  %v1526_v8 = vld [vmem:[%s1498_s23 + $0x28] sm:$0xff]  ;;  %v203_v9 = vmul.f32 %v1520_v6, %v1520_v6  ;;  %v204_v10 = vmul.f32 %v1523_v7, %v1523_v7  ;;  %v1535_v12 = vld [vmem:[%s1498_s23 + $0x30] sm:$0xff]  ;;  %v1538_v13 = vld [vmem:[%s1498_s23 + $0x38] sm:$0xff]  ;;  %s1986_s28 = scalar_lea.hbm %s2033_s1, %s1102_s24  ;;  %s1313_s30 = scalar_lea.vmem %s1988_s25, 8576 }
  0x3a   : > { %v205_v11 = vmul.f32 %v1526_v8, %v1526_v8  ;;  %v267_v14 = vrot.slane %v200_v3, 4  ;;  %v273_v15 = vrot.slane %v201_v4, 4  ;;  %v206_v17 = vmul.f32 %v1535_v12, %v1535_v12  ;;  %v1545_v62 = vld [vmem:[%s1498_s23 + $0x40] sm:$0xff]  ;;  %p1314_p6 = scmp.ne.s32.totalorder %s1988_s25, %s1313_s30  ;;  %p2041_p11 = scmp.ne.s32.totalorder %s2036_s17, 0 }
  0x3b   : > { %v279_v16 = vrot.slane %v202_v5, 4  ;;  %v285_v18 = vrot.slane %v203_v9, 4  ;;  %v291_v19 = vrot.slane %v204_v10, 4  ;;  %v207_v21 = vmul.f32 %v1538_v13, %v1538_v13  ;;  %s1382_s10 = smov [#allocation5]  }
  0x3c   : > { %v297_v20 = vrot.slane %v205_v11, 4  ;;  %v268_v22 = vadd.f32 %v267_v14, %v200_v3  ;;  %v274_v23 = vadd.f32 %v273_v15, %v201_v4  ;;  %v303_v25 = vrot.slane %v206_v17, 4  ;;  %p1315_p12 = pnand %p1314_p6, %p2041_p11  ;;  %s1317_s2 = sshll.u32 %s1382_s10, 4  ;;  %s1318_s2 = int_to_ptr.vmem [resolvable:$false] %s1317_s2 }
  0x3d   : > { %v280_v24 = vadd.f32 %v279_v16, %v202_v5  ;;  %v286_v26 = vadd.f32 %v285_v18, %v203_v9  ;;  %v292_v27 = vadd.f32 %v291_v19, %v204_v10  ;;  %v309_v29 = vrot.slane %v207_v21, 4  ;;  %v1548_v9 = vld [vmem:[%s1498_s23 + $0x48] sm:$0xff]  ;;  %v1551_v16 = vld [vmem:[%s1498_s23 + $0x50] sm:$0xff]  ;;  %s1319_s3 = scalar_lea.vmem %s1318_s2, 17152  ;;  %p1320_p5 = scmp.lt.s32.totalorder %s1988_s25, %s1318_s2 }
  0x3e   : > { %v298_v28 = vadd.f32 %v297_v20, %v205_v11  ;;  %v269_v30 = vrot.slane %v268_v22, 2  ;;  %v275_v31 = vrot.slane %v274_v23, 2  ;;  %v304_v33 = vadd.f32 %v303_v25, %v206_v17  ;;  %v1554_v17 = vld [vmem:[%s1498_s23 + $0x58] sm:$0xff]  ;;  %p1316_p13 = pneg %p1315_p12  ;;  %p1321_p10 = scmp.lt.s32.totalorder %s1319_s3, %s1313_s30 }
  0x3f   : > { %v281_v32 = vrot.slane %v280_v24, 2  ;;  %v287_v34 = vrot.slane %v286_v26, 2  ;;  %v293_v35 = vrot.slane %v292_v27, 2  ;;  %v310_v37 = vadd.f32 %v309_v29, %v207_v21 }
  0x40   : > { %v299_v36 = vrot.slane %v298_v28, 2  ;;  %v270_v38 = vadd.f32 %v269_v30, %v268_v22  ;;  %v276_v39 = vadd.f32 %v275_v31, %v274_v23  ;;  %v305_v41 = vrot.slane %v304_v33, 2  ;;  %p1322_p2 = por %p1321_p10, %p1320_p5 }
  0x41   : > { %v282_v40 = vadd.f32 %v281_v32, %v280_v24  ;;  %v288_v42 = vadd.f32 %v287_v34, %v286_v26  ;;  %v294_v43 = vadd.f32 %v293_v35, %v292_v27  ;;  %v311_v45 = vrot.slane %v310_v37, 2  ;;  %v1565_v32 = vld [vmem:[%s1498_s23 + $0x60] sm:$0xff] }
  0x42   : > { %v300_v44 = vadd.f32 %v299_v36, %v298_v28  ;;  %v271_v46 = vrot.slane %v270_v38, 1  ;;  %v277_v47 = vrot.slane %v276_v39, 1  ;;  %v306_v49 = vadd.f32 %v305_v41, %v304_v33  ;;  %v1568_v33 = vld [vmem:[%s1498_s23 + $0x68] sm:$0xff]  ;;  %p1323_p4 = pnand %p1322_p2, %p1316_p13 }
  0x43   : > { %v283_v48 = vrot.slane %v282_v40, 1  ;;  %v289_v50 = vrot.slane %v288_v42, 1  ;;  %v295_v51 = vrot.slane %v294_v43, 1  ;;  %v312_v53 = vadd.f32 %v311_v45, %v310_v37 }
  0x44   : > { %v301_v52 = vrot.slane %v300_v44, 1  ;;  %v272_v54 = vadd.f32 %v271_v46, %v270_v38  ;;  %v278_v55 = vadd.f32 %v277_v47, %v276_v39  ;;  %v307_v57 = vrot.slane %v306_v49, 1  ;;  %v1575_v46 = vld [vmem:[%s1498_s23 + $0x70] sm:$0xff] }
  0x45   : > { %v284_v56 = vadd.f32 %v283_v48, %v282_v40  ;;  %v290_v58 = vadd.f32 %v289_v50, %v288_v42  ;;  %v296_v59 = vadd.f32 %v295_v51, %v294_v43  ;;  %v313_v61 = vrot.slane %v312_v53, 1  ;;  %v1578_v50 = vld [vmem:[%s1498_s23 + $0x78] sm:$0xff] }
  0x46   : > { %v302_v60 = vadd.f32 %v301_v52, %v300_v44  ;;  %v671_v63 = vmul.f32 0.125, %v272_v54  ;;  %v672_v3 = vmul.f32 0.125, %v278_v55  ;;  %v308_v5 = vadd.f32 %v307_v57, %v306_v49 }
  0x47   : > { %v673_v4 = vmul.f32 0.125, %v284_v56  ;;  %v674_v10 = vmul.f32 0.125, %v290_v58  ;;  %v675_v11 = vmul.f32 0.125, %v296_v59  ;;  %v314_v15 = vadd.f32 %v313_v61, %v312_v53 }
  0x48   : > { %v676_v14 = vmul.f32 0.125, %v302_v60  ;;  %v738_v18 = vadd.f32 1e-08, %v671_v63  ;;  %v739_v19 = vadd.f32 1e-08, %v672_v3  ;;  %v208_v21 = vmul.f32 %v1545_v62, %v1545_v62 }
  0x49   : > { %v740_v20 = vadd.f32 1e-08, %v673_v4  ;;  %v741_v22 = vadd.f32 1e-08, %v674_v10  ;;  %v742_v23 = vadd.f32 1e-08, %v675_v11  ;;  %v209_v25 = vmul.f32 %v1548_v9, %v1548_v9 }
  0x4a   : > { %v743_v24 = vadd.f32 1e-08, %v676_v14  ;;  %1149 = vrsqrt.f32 %v738_v18  ;;  %v677_v26 = vmul.f32 0.125, %v308_v5  ;;  %v678_v27 = vmul.f32 0.125, %v314_v15 }
  0x4b   : > { %v315_v28 = vrot.slane %v208_v21, 4  ;;  %1151 = vrsqrt.f32 %v739_v19  ;;  %v321_v29 = vrot.slane %v209_v25, 4  ;;  %v210_v30 = vmul.f32 %v1551_v16, %v1551_v16 }
  0x4c   : > { %v211_v31 = vmul.f32 %v1554_v17, %v1554_v17  ;;  %1153 = vrsqrt.f32 %v740_v20  ;;  %v744_v34 = vadd.f32 1e-08, %v677_v26  ;;  %v745_v35 = vadd.f32 1e-08, %v678_v27 }
  0x4d   : > { %v316_v36 = vadd.f32 %v315_v28, %v208_v21  ;;  %1155 = vrsqrt.f32 %v741_v22  ;;  %v322_v37 = vadd.f32 %v321_v29, %v209_v25  ;;  %v327_v38 = vrot.slane %v210_v30, 4 }
  0x4e   : > { %v333_v39 = vrot.slane %v211_v31, 4  ;;  %1157 = vrsqrt.f32 %v742_v23  ;;  %v212_v41 = vmul.f32 %v1565_v32, %v1565_v32  ;;  %v213_v42 = vmul.f32 %v1568_v33, %v1568_v33 }
  0x4f   : > { %v317_v40 = vrot.slane %v316_v36, 2  ;;  %1159 = vrsqrt.f32 %v743_v24  ;;  %v323_v43 = vrot.slane %v322_v37, 2  ;;  %v328_v44 = vadd.f32 %v327_v38, %v210_v30 }
  0x50   : > { %v334_v45 = vadd.f32 %v333_v39, %v211_v31  ;;  %1161 = vrsqrt.f32 %v744_v34  ;;  %v339_v48 = vrot.slane %v212_v41, 4  ;;  %v345_v49 = vrot.slane %v213_v42, 4 }
  0x51   : > { %v318_v47 = vadd.f32 %v317_v40, %v316_v36  ;;  %1163 = vrsqrt.f32 %v745_v35  ;;  %v324_v51 = vadd.f32 %v323_v43, %v322_v37  ;;  %v329_v52 = vrot.slane %v328_v44, 2  ;;  %v1604_v43 = vld [vmem:[%s1498_s23 + $0x88] sm:$0xff] }
  0x52   : > { %v335_v53 = vrot.slane %v334_v45, 2  ;;  %v340_v55 = vadd.f32 %v339_v48, %v212_v41  ;;  %v346_v56 = vadd.f32 %v345_v49, %v213_v42  ;;  %v214_v57 = vmul.f32 %v1575_v46, %v1575_v46  ;;  %v1601_v42 = vld [vmem:[%s1498_s23 + $0x80] sm:$0xff] }
  0x53   : > { %v319_v54 = vrot.slane %v318_v47, 1  ;;  %v325_v58 = vrot.slane %v324_v51, 1  ;;  %v330_v59 = vadd.f32 %v329_v52, %v328_v44  ;;  %v1584_v61 = vmul.f32 %v1578_v50, %v1578_v50  ;;  %v1611_v52 = vld [vmem:[%s1498_s23 + $0x90] sm:$0xff] }
  0x54   : > { %v336_v60 = vadd.f32 %v335_v53, %v334_v45  ;;  %v1150_v63 = vpop.eup %1149  ;;  %v341_v4 = vrot.slane %v340_v55, 2  ;;  %v347_v5 = vrot.slane %v346_v56, 2  ;;  %v351_v10 = vrot.slane %v214_v57, 4 }
  0x55   : > { %v320_v3 = vadd.f32 %v319_v54, %v318_v47  ;;  %v1152_v11 = vpop.eup %1151  ;;  %v872_v14 = vmul.f32 %v1150_v63, %v1505_v0  ;;  %v326_v15 = vadd.f32 %v325_v58, %v324_v51  ;;  %v331_v18 = vrot.slane %v330_v59, 1 }
  0x56   : > { %v337_v19 = vrot.slane %v336_v60, 1  ;;  %v1154_v20 = vpop.eup %1153  ;;  %v873_v21 = vmul.f32 %v1152_v11, %v1508_v1  ;;  %v342_v23 = vadd.f32 %v341_v4, %v340_v55  ;;  %v348_v24 = vadd.f32 %v347_v5, %v346_v56  ;;  %v1620_v55 = vld [vmem:[%s1498_s23 + $0x98] sm:$0xff]  ;;  %v1623_v56 = vld [vmem:[%s1498_s23 + $0xa0] sm:$0xff]  ;;  %v1634_v11 = vld [vmem:[%s1498_s23 + $0xa8] sm:$0xff] }
  0x57   : > { %v679_v22 = vmul.f32 0.125, %v320_v3  ;;  %v1156_v25 = vpop.eup %1155  ;;  %939 = vst [vmem:[%s1590_s16] sm:$0xff] %v872_v14  ;;  %v874_v26 = vmul.f32 %v1154_v20, %v1511_v2  ;;  %v680_v0 = vmul.f32 0.125, %v326_v15  ;;  %v332_v27 = vadd.f32 %v331_v18, %v330_v59 }
  0x58   : > { %v338_v28 = vadd.f32 %v337_v19, %v336_v60  ;;  %v1158_v29 = vpop.eup %1157  ;;  %940 = vst [vmem:[%s1590_s16 + $0x8] sm:$0xff] %v873_v21  ;;  %v875_v1 = vmul.f32 %v1156_v25, %v1520_v6  ;;  %v343_v31 = vrot.slane %v342_v23, 1  ;;  %v349_v34 = vrot.slane %v348_v24, 1 }
  0x59   : > { %v746_v30 = vadd.f32 1e-08, %v679_v22  ;;  %v1160_v35 = vpop.eup %1159  ;;  %941 = vst [vmem:[%s1590_s16 + $0x10] sm:$0xff] %v874_v26  ;;  %v876_v36 = vmul.f32 %v1158_v29, %v1523_v7  ;;  %v747_v37 = vadd.f32 1e-08, %v680_v0  ;;  %v681_v2 = vmul.f32 0.125, %v332_v27 }
  0x5a   : > { %v682_v38 = vmul.f32 0.125, %v338_v28  ;;  %v1162_v39 = vpop.eup %1161  ;;  %942 = vst [vmem:[%s1590_s16 + $0x18] sm:$0xff] %v875_v1  ;;  %v877_v40 = vmul.f32 %v1160_v35, %v1526_v8  ;;  %v344_v6 = vadd.f32 %v343_v31, %v342_v23  ;;  %v350_v41 = vadd.f32 %v349_v34, %v348_v24 }
  0x5b   : > { %1165 = vrsqrt.f32 %v746_v30  ;;  %v1164_v44 = vpop.eup %1163  ;;  %943 = vst [vmem:[%s1590_s16 + $0x20] sm:$0xff] %v876_v36  ;;  %v878_v7 = vmul.f32 %v1162_v39, %v1535_v12  ;;  %v748_v45 = vadd.f32 1e-08, %v681_v2  ;;  %v352_v51 = vadd.f32 %v351_v10, %v214_v57 }
  0x5c   : > { %1167 = vrsqrt.f32 %v747_v37  ;;  %v749_v47 = vadd.f32 1e-08, %v682_v38  ;;  %944 = vst [vmem:[%s1590_s16 + $0x28] sm:$0xff] %v877_v40  ;;  %v879_v8 = vmul.f32 %v1164_v44, %v1538_v13  ;;  %v683_v48 = vmul.f32 0.125, %v344_v6 }
  0x5d   : > { %v684_v49 = vmul.f32 0.125, %v350_v41  ;;  %945 = vst [vmem:[%s1590_s16 + $0x30] sm:$0xff] %v878_v7  ;;  %1169 = vrsqrt.f32 %v748_v45  ;;  %v357_v53 = vrot.slane %v1584_v61, 4  ;;  %v216_v12 = vmul.f32 %v1601_v42, %v1601_v42 }
  0x5e   : > { %v217_v54 = vmul.f32 %v1604_v43, %v1604_v43  ;;  %946 = vst [vmem:[%s1590_s16 + $0x38] sm:$0xff] %v879_v8  ;;  %1171 = vrsqrt.f32 %v749_v47  ;;  %v750_v13 = vadd.f32 1e-08, %v683_v48  ;;  %v353_v58 = vrot.slane %v352_v51, 2 }
  0x5f   : > { %v751_v57 = vadd.f32 1e-08, %v684_v49  ;;  %v358_v59 = vadd.f32 %v357_v53, %v1584_v61  ;;  %v363_v60 = vrot.slane %v216_v12, 4  ;;  %v218_v3 = vmul.f32 %v1611_v52, %v1611_v52 }
  0x60   : > { %v369_v63 = vrot.slane %v217_v54, 4  ;;  %1173 = vrsqrt.f32 %v750_v13  ;;  %v354_v4 = vadd.f32 %v353_v58, %v352_v51  ;;  %v219_v5 = vmul.f32 %v1620_v55, %v1620_v55 }
  0x61   : > { %v220_v10 = vmul.f32 %v1623_v56, %v1623_v56  ;;  %1175 = vrsqrt.f32 %v751_v57  ;;  %v359_v14 = vrot.slane %v358_v59, 2  ;;  %v364_v15 = vadd.f32 %v363_v60, %v216_v12  ;;  %v1648_v60 = vld [vmem:[%s1498_s23 + $0xb0] sm:$0xff] }
  0x62   : > { %v370_v18 = vadd.f32 %v369_v63, %v217_v54  ;;  %v355_v61 = vrot.slane %v354_v4, 1  ;;  %v375_v19 = vrot.slane %v218_v3, 4  ;;  %v381_v20 = vrot.slane %v219_v5, 4 }
  0x63   : > { %v387_v21 = vrot.slane %v220_v10, 4  ;;  %v360_v22 = vadd.f32 %v359_v14, %v358_v59  ;;  %v365_v23 = vrot.slane %v364_v15, 2  ;;  %v221_v25 = vmul.f32 %v1634_v11, %v1634_v11  ;;  %v1655_v14 = vld [vmem:[%s1498_s23 + $0xc0] sm:$0xff] }
  0x64   : > { %v371_v24 = vrot.slane %v370_v18, 2  ;;  %v356_v0 = vadd.f32 %v355_v61, %v354_v4  ;;  %v376_v27 = vadd.f32 %v375_v19, %v218_v3  ;;  %v382_v28 = vadd.f32 %v381_v20, %v219_v5 }
  0x65   : > { %v1166_v26 = vpop.eup %1165  ;;  %v388_v29 = vadd.f32 %v387_v21, %v220_v10  ;;  %v361_v31 = vrot.slane %v360_v22, 1  ;;  %v366_v34 = vadd.f32 %v365_v23, %v364_v15  ;;  %v1652_v10 = vld [vmem:[%s1498_s23 + $0xb8] sm:$0xff]  ;;  %v224_v23 = vmul.f32 %v1655_v14, %v1655_v14 }
  0x66   : > { %v1168_v1 = vpop.eup %1167  ;;  %v880_v30 = vmul.f32 %v1166_v26, %v1545_v62  ;;  %v372_v35 = vadd.f32 %v371_v24, %v370_v18  ;;  %v685_v37 = vmul.f32 0.125, %v356_v0  ;;  %v377_v2 = vrot.slane %v376_v27, 2  ;;  %v1666_v24 = vld [vmem:[%s1498_s23 + $0xc8] sm:$0xff]  ;;  %v1669_v26 = vld [vmem:[%s1498_s23 + $0xd0] sm:$0xff] }
  0x67   : > { %v881_v36 = vmul.f32 %v1168_v1, %v1548_v9  ;;  %v383_v38 = vrot.slane %v382_v28, 2  ;;  %v1170_v39 = vpop.eup %1169  ;;  %v362_v40 = vadd.f32 %v361_v31, %v360_v22  ;;  %v367_v6 = vrot.slane %v366_v34, 1 }
  0x68   : > { %947 = vst [vmem:[%s1590_s16 + $0x40] sm:$0xff] %v880_v30  ;;  %v373_v41 = vrot.slane %v372_v35, 1  ;;  %v389_v44 = vrot.slane %v388_v29, 2  ;;  %v1172_v7 = vpop.eup %1171  ;;  %v882_v62 = vmul.f32 %v1170_v39, %v1551_v16  ;;  %v752_v45 = vadd.f32 1e-08, %v685_v37 }
  0x69   : > { %948 = vst [vmem:[%s1590_s16 + $0x48] sm:$0xff] %v881_v36  ;;  %v378_v47 = vadd.f32 %v377_v2, %v376_v27  ;;  %v384_v8 = vadd.f32 %v383_v38, %v382_v28  ;;  %v883_v9 = vmul.f32 %v1172_v7, %v1554_v17  ;;  %v686_v48 = vmul.f32 0.125, %v362_v40  ;;  %v1676_v38 = vld [vmem:[%s1498_s23 + $0xd8] sm:$0xff] }
  0x6a   : > { %v368_v49 = vadd.f32 %v367_v6, %v366_v34  ;;  %v374_v51 = vadd.f32 %v373_v41, %v372_v35  ;;  %v1174_v53 = vpop.eup %1173  ;;  %949 = vst [vmem:[%s1590_s16 + $0x50] sm:$0xff] %v882_v62  ;;  %1177 = vrsqrt.f32 %v752_v45  ;;  %v390_v13 = vadd.f32 %v389_v44, %v388_v29  ;;  %v1679_v44 = vld [vmem:[%s1498_s23 + $0xe0] sm:$0xff] }
  0x6b   : > { %v379_v12 = vrot.slane %v378_v47, 1  ;;  %v385_v54 = vrot.slane %v384_v8, 1  ;;  %v1176_v57 = vpop.eup %1175  ;;  %950 = vst [vmem:[%s1590_s16 + $0x58] sm:$0xff] %v883_v9  ;;  %v884_v16 = vmul.f32 %v1174_v53, %v1565_v32  ;;  %v753_v58 = vadd.f32 1e-08, %v686_v48 }
  0x6c   : > { %v687_v17 = vmul.f32 0.125, %v368_v49  ;;  %v688_v59 = vmul.f32 0.125, %v374_v51  ;;  %v885_v63 = vmul.f32 %v1176_v57, %v1568_v33  ;;  %v391_v5 = vrot.slane %v390_v13, 1 }
  0x6d   : > { %v380_v3 = vadd.f32 %v379_v12, %v378_v47  ;;  %v386_v4 = vadd.f32 %v385_v54, %v384_v8  ;;  %951 = vst [vmem:[%s1590_s16 + $0x60] sm:$0xff] %v884_v16  ;;  %1179 = vrsqrt.f32 %v753_v58  ;;  %v393_v18 = vrot.slane %v221_v25, 4 }
  0x6e   : > { %v754_v32 = vadd.f32 1e-08, %v687_v17  ;;  %v755_v15 = vadd.f32 1e-08, %v688_v59  ;;  %952 = vst [vmem:[%s1590_s16 + $0x68] sm:$0xff] %v885_v63  ;;  %v392_v20 = vadd.f32 %v391_v5, %v390_v13  ;;  %v222_v33 = vmul.f32 %v1648_v60, %v1648_v60 }
  0x6f   : > { %v689_v61 = vmul.f32 0.125, %v380_v3  ;;  %v690_v19 = vmul.f32 0.125, %v386_v4  ;;  %v394_v21 = vadd.f32 %v393_v18, %v221_v25  ;;  %v223_v22 = vmul.f32 %v1652_v10, %v1652_v10 }
  0x70   : > { %1181 = vrsqrt.f32 %v754_v32  ;;  %v691_v28 = vmul.f32 0.125, %v392_v20  ;;  %v399_v1 = vrot.slane %v222_v33, 4  ;;  %v411_v25 = vrot.slane %v224_v23, 4 }
  0x71   : > { %1183 = vrsqrt.f32 %v755_v15  ;;  %v756_v0 = vadd.f32 1e-08, %v689_v61  ;;  %v757_v27 = vadd.f32 1e-08, %v690_v19  ;;  %v395_v29 = vrot.slane %v394_v21, 2 }
  0x72   : > { %v405_v30 = vrot.slane %v223_v22, 4  ;;  %v758_v31 = vadd.f32 1e-08, %v691_v28  ;;  %v225_v34 = vmul.f32 %v1666_v24, %v1666_v24  ;;  %v226_v35 = vmul.f32 %v1669_v26, %v1669_v26 }
  0x73   : > { %1185 = vrsqrt.f32 %v756_v0  ;;  %v396_v36 = vadd.f32 %v395_v29, %v394_v21  ;;  %v400_v37 = vadd.f32 %v399_v1, %v222_v33  ;;  %v412_v40 = vadd.f32 %v411_v25, %v224_v23 }
  0x74   : > { %1187 = vrsqrt.f32 %v757_v27  ;;  %v406_v2 = vadd.f32 %v405_v30, %v223_v22  ;;  %v1178_v39 = vpop.eup %1177  ;;  %v417_v6 = vrot.slane %v225_v34, 4  ;;  %v423_v41 = vrot.slane %v226_v35, 4 }
  0x75   : > { %1189 = vrsqrt.f32 %v758_v31  ;;  %v886_v7 = vmul.f32 %v1178_v39, %v1575_v46  ;;  %v397_v62 = vrot.slane %v396_v36, 1  ;;  %v401_v45 = vrot.slane %v400_v37, 2 }
  0x76   : > { %v407_v47 = vrot.slane %v406_v2, 2  ;;  %v413_v8 = vrot.slane %v412_v40, 2  ;;  %v418_v9 = vadd.f32 %v417_v6, %v225_v34  ;;  %v424_v48 = vadd.f32 %v423_v41, %v226_v35  ;;  %v1696_v35 = vld [vmem:[%s1498_s23 + $0xe8] sm:$0xff] }
  0x77   : > { %v227_v49 = vmul.f32 %v1676_v38, %v1676_v38  ;;  %v1180_v51 = vpop.eup %1179  ;;  %953 = vst [vmem:[%s1590_s16 + $0x70] sm:$0xff] %v886_v7  ;;  %v398_v53 = vadd.f32 %v397_v62, %v396_v36  ;;  %v402_v12 = vadd.f32 %v401_v45, %v400_v37  ;;  %v228_v13 = vmul.f32 %v1679_v44, %v1679_v44  ;;  %v1699_v36 = vld [vmem:[%s1498_s23 + $0xf0] sm:$0xff] }
  0x78   : > { %v408_v54 = vadd.f32 %v407_v47, %v406_v2  ;;  %v887_v46 = vmul.f32 %v1180_v51, %v1578_v50  ;;  %v414_v57 = vadd.f32 %v413_v8, %v412_v40  ;;  %v419_v16 = vrot.slane %v418_v9, 2  ;;  %v1713_v47 = vld [vmem:[%s1498_s23 + $0x100] sm:$0xff] }
  0x79   : > { %v425_v58 = vrot.slane %v424_v48, 2  ;;  %v692_v59 = vmul.f32 0.125, %v398_v53  ;;  %v403_v63 = vrot.slane %v402_v12, 1  ;;  %v429_v4 = vrot.slane %v227_v49, 4 }
  0x7a   : > { %v1182_v17 = vpop.eup %1181  ;;  %v409_v3 = vrot.slane %v408_v54, 1  ;;  %954 = vst [vmem:[%s1590_s16 + $0x78] sm:$0xff] %v887_v46  ;;  %v415_v15 = vrot.slane %v414_v57, 1  ;;  %v420_v18 = vadd.f32 %v419_v16, %v418_v9  ;;  %v435_v41 = vrot.slane %v228_v13, 4  ;;  %v1723_v16 = vld [vmem:[%s1498_s23 + $0x110] sm:$0xff] }
  0x7b   : > { %v1184_v5 = vpop.eup %1183  ;;  %v888_v32 = vmul.f32 %v1182_v17, %v1601_v42  ;;  %v426_v61 = vadd.f32 %v425_v58, %v424_v48  ;;  %v759_v50 = vadd.f32 1e-08, %v692_v59  ;;  %v404_v20 = vadd.f32 %v403_v63, %v402_v12  ;;  %v1716_v12 = vld [vmem:[%s1498_s23 + $0x108] sm:$0xff] }
  0x7c   : > { %v889_v19 = vmul.f32 %v1184_v5, %v1604_v43  ;;  %v410_v33 = vadd.f32 %v409_v3, %v408_v54  ;;  %v416_v22 = vadd.f32 %v415_v15, %v414_v57  ;;  %v421_v23 = vrot.slane %v420_v18, 1 }
  0x7d   : > { %v1186_v21 = vpop.eup %1185  ;;  %955 = vst [vmem:[%s1590_s16 + $0x80] sm:$0xff] %v888_v32  ;;  %v427_v0 = vrot.slane %v426_v61, 1  ;;  %v430_v27 = vadd.f32 %v429_v4, %v227_v49  ;;  %1191 = vrsqrt.f32 %v759_v50  ;;  %v693_v29 = vmul.f32 0.125, %v404_v20 }
  0x7e   : > { %v1188_v28 = vpop.eup %1187  ;;  %956 = vst [vmem:[%s1590_s16 + $0x88] sm:$0xff] %v889_v19  ;;  %v890_v42 = vmul.f32 %v1186_v21, %v1611_v52  ;;  %v694_v43 = vmul.f32 0.125, %v410_v33  ;;  %v695_v25 = vmul.f32 0.125, %v416_v22  ;;  %v422_v31 = vadd.f32 %v421_v23, %v420_v18 }
  0x7f   : > { %v1190_v1 = vpop.eup %1189  ;;  %v891_v30 = vmul.f32 %v1188_v28, %v1620_v55  ;;  %v428_v34 = vadd.f32 %v427_v0, %v426_v61  ;;  %v760_v37 = vadd.f32 1e-08, %v693_v29  ;;  %v431_v39 = vrot.slane %v430_v27, 2 }
  0x80   : > { %957 = vst [vmem:[%s1590_s16 + $0x90] sm:$0xff] %v890_v42  ;;  %v892_v52 = vmul.f32 %v1190_v1, %v1623_v56  ;;  %v761_v2 = vadd.f32 1e-08, %v694_v43  ;;  %v762_v40 = vadd.f32 1e-08, %v695_v25  ;;  %v696_v6 = vmul.f32 0.125, %v422_v31 }
  0x81   : > { %958 = vst [vmem:[%s1590_s16 + $0x98] sm:$0xff] %v891_v30  ;;  %v697_v55 = vmul.f32 0.125, %v428_v34  ;;  %1193 = vrsqrt.f32 %v760_v37  ;;  %v432_v7 = vadd.f32 %v431_v39, %v430_v27  ;;  %v229_v62 = vmul.f32 %v1696_v35, %v1696_v35  ;;  %v1710_v56 = vld [vmem:[%s1498_s23 + $0xf8] sm:$0xff] }
  0x82   : > { %959 = vst [vmem:[%s1590_s16 + $0xa0] sm:$0xff] %v892_v52  ;;  %v230_v45 = vmul.f32 %v1699_v36, %v1699_v36  ;;  %1195 = vrsqrt.f32 %v761_v2  ;;  %v763_v8 = vadd.f32 1e-08, %v696_v6  ;;  %v436_v48 = vadd.f32 %v435_v41, %v228_v13 }
  0x83   : > { %v764_v9 = vadd.f32 1e-08, %v697_v55  ;;  %1197 = vrsqrt.f32 %v762_v40  ;;  %v433_v49 = vrot.slane %v432_v7, 1  ;;  %v441_v51 = vrot.slane %v229_v62, 4 }
  0x84   : > { %v447_v53 = vrot.slane %v230_v45, 4  ;;  %1199 = vrsqrt.f32 %v763_v8  ;;  %v437_v54 = vrot.slane %v436_v48, 2  ;;  %v231_v46 = vmul.f32 %v1710_v56, %v1710_v56 }
  0x85   : > { %v232_v57 = vmul.f32 %v1713_v47, %v1713_v47  ;;  %1201 = vrsqrt.f32 %v764_v9  ;;  %v434_v58 = vadd.f32 %v433_v49, %v432_v7  ;;  %v442_v17 = vadd.f32 %v441_v51, %v229_v62  ;;  %v1738_v51 = vld [vmem:[%s1498_s23 + $0x118] sm:$0xff] }
  0x86   : > { %v448_v13 = vadd.f32 %v447_v53, %v230_v45  ;;  %v438_v59 = vadd.f32 %v437_v54, %v436_v48  ;;  %v453_v63 = vrot.slane %v231_v46, 4  ;;  %v233_v4 = vmul.f32 %v1716_v12, %v1716_v12  ;;  %v1741_v53 = vld [vmem:[%s1498_s23 + $0x120] sm:$0xff] }
  0x87   : > { %v459_v3 = vrot.slane %v232_v57, 4  ;;  %v1192_v5 = vpop.eup %1191  ;;  %v698_v32 = vmul.f32 0.125, %v434_v58  ;;  %v443_v15 = vrot.slane %v442_v17, 2  ;;  %v234_v61 = vmul.f32 %v1723_v16, %v1723_v16 }
  0x88   : > { %v449_v18 = vrot.slane %v448_v13, 2  ;;  %v893_v19 = vmul.f32 %v1192_v5, %v1634_v11  ;;  %v439_v50 = vrot.slane %v438_v59, 1  ;;  %v454_v20 = vadd.f32 %v453_v63, %v231_v46 }
  0x89   : > { %v460_v33 = vadd.f32 %v459_v3, %v232_v57  ;;  %v765_v21 = vadd.f32 1e-08, %v698_v32  ;;  %v444_v22 = vadd.f32 %v443_v15, %v442_v17  ;;  %v465_v0 = vrot.slane %v233_v4, 4  ;;  %v1746_v57 = vld [vmem:[%s1498_s23 + $0x128] sm:$0xff]  ;;  %v1757_v15 = vld [vmem:[%s1498_s23 + $0x130] sm:$0xff] }
  0x8a   : > { %v450_v23 = vadd.f32 %v449_v18, %v448_v13  ;;  %960 = vst [vmem:[%s1590_s16 + $0xa8] sm:$0xff] %v893_v19  ;;  %v440_v27 = vadd.f32 %v439_v50, %v438_v59  ;;  %v455_v28 = vrot.slane %v454_v20, 2  ;;  %v471_v29 = vrot.slane %v234_v61, 4 }
  0x8b   : > { %v461_v42 = vrot.slane %v460_v33, 2  ;;  %v1194_v43 = vpop.eup %1193  ;;  %1203 = vrsqrt.f32 %v765_v21  ;;  %v445_v1 = vrot.slane %v444_v22, 1  ;;  %v466_v25 = vadd.f32 %v465_v0, %v233_v4 }
  0x8c   : > { %v451_v30 = vrot.slane %v450_v23, 1  ;;  %v1196_v31 = vpop.eup %1195  ;;  %v894_v11 = vmul.f32 %v1194_v43, %v1648_v60  ;;  %v699_v34 = vmul.f32 0.125, %v440_v27  ;;  %v456_v52 = vadd.f32 %v455_v28, %v454_v20 }
  0x8d   : > { %v462_v37 = vadd.f32 %v461_v42, %v460_v33  ;;  %v1198_v2 = vpop.eup %1197  ;;  %v895_v39 = vmul.f32 %v1196_v31, %v1652_v10  ;;  %v446_v40 = vadd.f32 %v445_v1, %v444_v22  ;;  %v467_v55 = vrot.slane %v466_v25, 2  ;;  %v1766_v42 = vld [vmem:[%s1498_s23 + $0x140] sm:$0xff] }
  0x8e   : > { %v452_v6 = vadd.f32 %v451_v30, %v450_v23  ;;  %v1200_v41 = vpop.eup %1199  ;;  %961 = vst [vmem:[%s1590_s16 + $0xb0] sm:$0xff] %v894_v11  ;;  %v896_v7 = vmul.f32 %v1198_v2, %v1655_v14  ;;  %v766_v62 = vadd.f32 1e-08, %v699_v34  ;;  %v457_v60 = vrot.slane %v456_v52, 1  ;;  %v1760_v23 = vld [vmem:[%s1498_s23 + $0x138] sm:$0xff] }
  0x8f   : > { %v463_v45 = vrot.slane %v462_v37, 1  ;;  %v1202_v8 = vpop.eup %1201  ;;  %962 = vst [vmem:[%s1590_s16 + $0xb8] sm:$0xff] %v895_v39  ;;  %v897_v9 = vmul.f32 %v1200_v41, %v1666_v24  ;;  %v700_v10 = vmul.f32 0.125, %v446_v40  ;;  %v468_v49 = vadd.f32 %v467_v55, %v466_v25  ;;  %v1774_v55 = vld [vmem:[%s1498_s23 + $0x148] sm:$0xff] }
  0x90   : > { %v701_v48 = vmul.f32 0.125, %v452_v6  ;;  %963 = vst [vmem:[%s1590_s16 + $0xc0] sm:$0xff] %v896_v7  ;;  %v898_v14 = vmul.f32 %v1202_v8, %v1669_v26  ;;  %1205 = vrsqrt.f32 %v766_v62  ;;  %v458_v54 = vadd.f32 %v457_v60, %v456_v52 }
  0x91   : > { %v464_v46 = vadd.f32 %v463_v45, %v462_v37  ;;  %964 = vst [vmem:[%s1590_s16 + $0xc8] sm:$0xff] %v897_v9  ;;  %v767_v58 = vadd.f32 1e-08, %v700_v10  ;;  %v469_v17 = vrot.slane %v468_v49, 1  ;;  %v472_v13 = vadd.f32 %v471_v29, %v234_v61 }
  0x92   : > { %v768_v24 = vadd.f32 1e-08, %v701_v48  ;;  %965 = vst [vmem:[%s1590_s16 + $0xd0] sm:$0xff] %v898_v14  ;;  %v702_v59 = vmul.f32 0.125, %v458_v54  ;;  %v235_v3 = vmul.f32 %v1738_v51, %v1738_v51  ;;  %v236_v26 = vmul.f32 %v1741_v53, %v1741_v53 }
  0x93   : > { %v703_v63 = vmul.f32 0.125, %v464_v46  ;;  %1207 = vrsqrt.f32 %v767_v58  ;;  %v470_v4 = vadd.f32 %v469_v17, %v468_v49  ;;  %v473_v5 = vrot.slane %v472_v13, 2 }
  0x94   : > { %v237_v32 = vmul.f32 %v1746_v57, %v1746_v57  ;;  %1209 = vrsqrt.f32 %v768_v24  ;;  %v769_v18 = vadd.f32 1e-08, %v702_v59  ;;  %v477_v19 = vrot.slane %v235_v3, 4 }
  0x95   : > { %v770_v61 = vadd.f32 1e-08, %v703_v63  ;;  %v1204_v50 = vpop.eup %1203  ;;  %v704_v20 = vmul.f32 0.125, %v470_v4  ;;  %v474_v33 = vadd.f32 %v473_v5, %v472_v13  ;;  %v483_v21 = vrot.slane %v236_v26, 4 }
  0x96   : > { %v489_v22 = vrot.slane %v237_v32, 4  ;;  %v899_v0 = vmul.f32 %v1204_v50, %v1676_v38  ;;  %1211 = vrsqrt.f32 %v769_v18  ;;  %v478_v27 = vadd.f32 %v477_v19, %v235_v3 }
  0x97   : > { %v238_v28 = vmul.f32 %v1757_v15, %v1757_v15  ;;  %1213 = vrsqrt.f32 %v770_v61  ;;  %v771_v29 = vadd.f32 1e-08, %v704_v20  ;;  %v475_v43 = vrot.slane %v474_v33, 1 }
  0x98   : > { %v484_v1 = vadd.f32 %v483_v21, %v236_v26  ;;  %966 = vst [vmem:[%s1590_s16 + $0xd8] sm:$0xff] %v899_v0  ;;  %v479_v30 = vrot.slane %v478_v27, 2  ;;  %v490_v25 = vadd.f32 %v489_v22, %v237_v32  ;;  %v239_v11 = vmul.f32 %v1760_v23, %v1760_v23 }
  0x99   : > { %v495_v31 = vrot.slane %v238_v28, 4  ;;  %1215 = vrsqrt.f32 %v771_v29  ;;  %v476_v38 = vadd.f32 %v475_v43, %v474_v33  ;;  %v240_v52 = vmul.f32 %v1766_v42, %v1766_v42 }
  0x9a   : > { %v485_v34 = vrot.slane %v484_v1, 2  ;;  %v1206_v37 = vpop.eup %1205  ;;  %v480_v2 = vadd.f32 %v479_v30, %v478_v27  ;;  %v491_v39 = vrot.slane %v490_v25, 2  ;;  %v501_v6 = vrot.slane %v239_v11, 4 }
  0x9b   : > { %v496_v40 = vadd.f32 %v495_v31, %v238_v28  ;;  %v900_v41 = vmul.f32 %v1206_v37, %v1679_v44  ;;  %v705_v7 = vmul.f32 0.125, %v476_v38  ;;  %v507_v60 = vrot.slane %v240_v52, 4  ;;  %v1796_v31 = vld [vmem:[%s1498_s23 + $0x160] sm:$0xff] }
  0x9c   : > { %v486_v62 = vadd.f32 %v485_v34, %v484_v1  ;;  %v481_v45 = vrot.slane %v480_v2, 1  ;;  %v492_v8 = vadd.f32 %v491_v39, %v490_v25  ;;  %v502_v10 = vadd.f32 %v501_v6, %v239_v11  ;;  %v1788_v1 = vld [vmem:[%s1498_s23 + $0x150] sm:$0xff] }
  0x9d   : > { %v497_v9 = vrot.slane %v496_v40, 2  ;;  %v1208_v48 = vpop.eup %1207  ;;  %967 = vst [vmem:[%s1590_s16 + $0xe0] sm:$0xff] %v900_v41  ;;  %v772_v49 = vadd.f32 1e-08, %v705_v7  ;;  %v508_v54 = vadd.f32 %v507_v60, %v240_v52  ;;  %v241_v46 = vmul.f32 %v1774_v55, %v1774_v55  ;;  %v1799_v52 = vld [vmem:[%s1498_s23 + $0x168] sm:$0xff] }
  0x9e   : > { %v487_v14 = vrot.slane %v486_v62, 1  ;;  %v1210_v58 = vpop.eup %1209  ;;  %v901_v44 = vmul.f32 %v1208_v48, %v1696_v35  ;;  %v482_v24 = vadd.f32 %v481_v45, %v480_v2  ;;  %v493_v17 = vrot.slane %v492_v8, 1 }
  0x9f   : > { %v498_v13 = vadd.f32 %v497_v9, %v496_v40  ;;  %v902_v59 = vmul.f32 %v1210_v58, %v1699_v36  ;;  %1217 = vrsqrt.f32 %v772_v49  ;;  %v503_v3 = vrot.slane %v502_v10, 2  ;;  %v1811_v49 = vld [vmem:[%s1498_s23 + $0x170] sm:$0xff] }
  0xa0   : > { %v488_v63 = vadd.f32 %v487_v14, %v486_v62  ;;  %v1212_v26 = vpop.eup %1211  ;;  %968 = vst [vmem:[%s1590_s16 + $0xe8] sm:$0xff] %v901_v44  ;;  %v706_v4 = vmul.f32 0.125, %v482_v24  ;;  %v494_v5 = vadd.f32 %v493_v17, %v492_v8  ;;  %v509_v18 = vrot.slane %v508_v54, 2  ;;  %v1815_v44 = vld [vmem:[%s1498_s23 + $0x178] sm:$0xff] }
  0xa1   : > { %v499_v32 = vrot.slane %v498_v13, 1  ;;  %v1214_v61 = vpop.eup %1213  ;;  %969 = vst [vmem:[%s1590_s16 + $0xf0] sm:$0xff] %v902_v59  ;;  %v903_v35 = vmul.f32 %v1212_v26, %v1710_v56  ;;  %v504_v50 = vadd.f32 %v503_v3, %v502_v10  ;;  %v513_v36 = vrot.slane %v241_v46, 4  ;;  %v1791_v56 = vld [vmem:[%s1498_s23 + $0x158] sm:$0xff] }
  0xa2   : > { %v707_v19 = vmul.f32 0.125, %v488_v63  ;;  %v904_v20 = vmul.f32 %v1214_v61, %v1713_v47  ;;  %v773_v33 = vadd.f32 1e-08, %v706_v4  ;;  %v708_v21 = vmul.f32 0.125, %v494_v5 }
  0xa3   : > { %v500_v22 = vadd.f32 %v499_v32, %v498_v13  ;;  %v1216_v0 = vpop.eup %1215  ;;  %970 = vst [vmem:[%s1590_s16 + $0xf8] sm:$0xff] %v903_v35  ;;  %v505_v28 = vrot.slane %v504_v50, 1  ;;  %v510_v29 = vadd.f32 %v509_v18, %v508_v54  ;;  %v514_v43 = vadd.f32 %v513_v36, %v241_v46 }
  0xa4   : > { %v774_v27 = vadd.f32 1e-08, %v707_v19  ;;  %971 = vst [vmem:[%s1590_s16 + $0x100] sm:$0xff] %v904_v20  ;;  %v905_v30 = vmul.f32 %v1216_v0, %v1716_v12  ;;  %1219 = vrsqrt.f32 %v773_v33  ;;  %v775_v47 = vadd.f32 1e-08, %v708_v21 }
  0xa5   : > { %v709_v25 = vmul.f32 0.125, %v500_v22  ;;  %v506_v11 = vadd.f32 %v505_v28, %v504_v50  ;;  %v511_v38 = vrot.slane %v510_v29, 1  ;;  %v515_v34 = vrot.slane %v514_v43, 2 }
  0xa6   : > { %1221 = vrsqrt.f32 %v774_v27  ;;  %972 = vst [vmem:[%s1590_s16 + $0x108] sm:$0xff] %v905_v30  ;;  %v242_v2 = vmul.f32 %v1788_v1, %v1788_v1  ;;  %v243_v12 = vmul.f32 %v1791_v56, %v1791_v56  ;;  %v244_v41 = vmul.f32 %v1796_v31, %v1796_v31 }
  0xa7   : > { %1223 = vrsqrt.f32 %v775_v47  ;;  %v776_v37 = vadd.f32 1e-08, %v709_v25  ;;  %v710_v39 = vmul.f32 0.125, %v506_v11  ;;  %v512_v40 = vadd.f32 %v511_v38, %v510_v29 }
  0xa8   : > { %v516_v6 = vadd.f32 %v515_v34, %v514_v43  ;;  %v519_v7 = vrot.slane %v242_v2, 4  ;;  %v525_v62 = vrot.slane %v243_v12, 4  ;;  %v245_v60 = vmul.f32 %v1799_v52, %v1799_v52  ;;  %v1825_v43 = vld [vmem:[%s1498_s23 + $0x180] sm:$0xff] }
  0xa9   : > { %1225 = vrsqrt.f32 %v776_v37  ;;  %v1218_v45 = vpop.eup %1217  ;;  %v777_v8 = vadd.f32 1e-08, %v710_v39  ;;  %v711_v9 = vmul.f32 0.125, %v512_v40  ;;  %v531_v48 = vrot.slane %v244_v41, 4  ;;  %v1831_v37 = vld [vmem:[%s1498_s23 + $0x188] sm:$0xff] }
  0xaa   : > { %v517_v10 = vrot.slane %v516_v6, 1  ;;  %v906_v14 = vmul.f32 %v1218_v45, %v1723_v16  ;;  %v520_v54 = vadd.f32 %v519_v7, %v242_v2  ;;  %v526_v46 = vadd.f32 %v525_v62, %v243_v12 }
  0xab   : > { %v537_v58 = vrot.slane %v245_v60, 4  ;;  %1227 = vrsqrt.f32 %v777_v8  ;;  %v778_v24 = vadd.f32 1e-08, %v711_v9  ;;  %v532_v13 = vadd.f32 %v531_v48, %v244_v41 }
  0xac   : > { %v518_v17 = vadd.f32 %v517_v10, %v516_v6  ;;  %973 = vst [vmem:[%s1590_s16 + $0x110] sm:$0xff] %v906_v14  ;;  %v521_v59 = vrot.slane %v520_v54, 2  ;;  %v527_v63 = vrot.slane %v526_v46, 2  ;;  %v246_v26 = vmul.f32 %v1811_v49, %v1811_v49 }
  0xad   : > { %v538_v3 = vadd.f32 %v537_v58, %v245_v60  ;;  %1229 = vrsqrt.f32 %v778_v24  ;;  %v533_v5 = vrot.slane %v532_v13, 2  ;;  %v247_v16 = vmul.f32 %v1815_v44, %v1815_v44 }
  0xae   : > { %v712_v4 = vmul.f32 0.125, %v518_v17  ;;  %v1220_v32 = vpop.eup %1219  ;;  %v522_v18 = vadd.f32 %v521_v59, %v520_v54  ;;  %v528_v61 = vadd.f32 %v527_v63, %v526_v46  ;;  %v543_v19 = vrot.slane %v246_v26, 4  ;;  %v1845_v59 = vld [vmem:[%s1498_s23 + $0x198] sm:$0xff] }
  0xaf   : > { %v539_v35 = vrot.slane %v538_v3, 2  ;;  %v907_v36 = vmul.f32 %v1220_v32, %v1738_v51  ;;  %v534_v33 = vadd.f32 %v533_v5, %v532_v13  ;;  %v549_v21 = vrot.slane %v247_v16, 4  ;;  %v1842_v13 = vld [vmem:[%s1498_s23 + $0x190] sm:$0xff] }
  0xb0   : > { %v1222_v50 = vpop.eup %1221  ;;  %v779_v20 = vadd.f32 1e-08, %v712_v4  ;;  %v523_v27 = vrot.slane %v522_v18, 1  ;;  %v529_v28 = vrot.slane %v528_v61, 1  ;;  %v544_v51 = vadd.f32 %v543_v19, %v246_v26 }
  0xb1   : > { %v1224_v22 = vpop.eup %1223  ;;  %v908_v0 = vmul.f32 %v1222_v50, %v1741_v53  ;;  %v540_v29 = vadd.f32 %v539_v35, %v538_v3  ;;  %974 = vst [vmem:[%s1590_s16 + $0x118] sm:$0xff] %v907_v36  ;;  %v535_v47 = vrot.slane %v534_v33, 1  ;;  %v550_v53 = vadd.f32 %v549_v21, %v247_v16  ;;  %v1858_v36 = vld [vmem:[%s1498_s23 + $0x1a8] sm:$0xff] }
  0xb2   : > { %v909_v30 = vmul.f32 %v1224_v22, %v1746_v57  ;;  %1231 = vrsqrt.f32 %v779_v20  ;;  %v524_v11 = vadd.f32 %v523_v27, %v522_v18  ;;  %v530_v38 = vadd.f32 %v529_v28, %v528_v61  ;;  %v1855_v61 = vld [vmem:[%s1498_s23 + $0x1a0] sm:$0xff] }
  0xb3   : > { %v1226_v25 = vpop.eup %1225  ;;  %975 = vst [vmem:[%s1590_s16 + $0x120] sm:$0xff] %v908_v0  ;;  %v541_v34 = vrot.slane %v540_v29, 1  ;;  %v536_v12 = vadd.f32 %v535_v47, %v534_v33  ;;  %v545_v39 = vrot.slane %v544_v51, 2  ;;  %v248_v57 = vmul.f32 %v1825_v43, %v1825_v43 }
  0xb4   : > { %976 = vst [vmem:[%s1590_s16 + $0x128] sm:$0xff] %v909_v30  ;;  %v910_v2 = vmul.f32 %v1226_v25, %v1757_v15  ;;  %v713_v40 = vmul.f32 0.125, %v524_v11  ;;  %v714_v6 = vmul.f32 0.125, %v530_v38  ;;  %v551_v7 = vrot.slane %v550_v53, 2  ;;  %v1867_v11 = vld [vmem:[%s1498_s23 + $0x1b0] sm:$0xff] }
  0xb5   : > { %v542_v41 = vadd.f32 %v541_v34, %v540_v29  ;;  %v1228_v62 = vpop.eup %1227  ;;  %v715_v60 = vmul.f32 0.125, %v536_v12  ;;  %v546_v45 = vadd.f32 %v545_v39, %v544_v51  ;;  %v555_v8 = vrot.slane %v248_v57, 4 }
  0xb6   : > { %977 = vst [vmem:[%s1590_s16 + $0x130] sm:$0xff] %v910_v2  ;;  %v249_v15 = vmul.f32 %v1831_v37, %v1831_v37  ;;  %v911_v9 = vmul.f32 %v1228_v62, %v1760_v23  ;;  %v780_v10 = vadd.f32 1e-08, %v713_v40  ;;  %v781_v48 = vadd.f32 1e-08, %v714_v6 }
  0xb7   : > { %v716_v14 = vmul.f32 0.125, %v542_v41  ;;  %v1230_v54 = vpop.eup %1229  ;;  %v782_v46 = vadd.f32 1e-08, %v715_v60  ;;  %v547_v58 = vrot.slane %v546_v45, 1  ;;  %v552_v24 = vadd.f32 %v551_v7, %v550_v53 }
  0xb8   : > { %v556_v17 = vadd.f32 %v555_v8, %v248_v57  ;;  %978 = vst [vmem:[%s1590_s16 + $0x138] sm:$0xff] %v911_v9  ;;  %v912_v63 = vmul.f32 %v1230_v54, %v1766_v42  ;;  %1233 = vrsqrt.f32 %v780_v10  ;;  %v561_v23 = vrot.slane %v249_v15, 4 }
  0xb9   : > { %v783_v3 = vadd.f32 1e-08, %v716_v14  ;;  %1235 = vrsqrt.f32 %v781_v48  ;;  %v548_v26 = vadd.f32 %v547_v58, %v546_v45  ;;  %v553_v4 = vrot.slane %v552_v24, 1 }
  0xba   : > { %v557_v5 = vrot.slane %v556_v17, 2  ;;  %979 = vst [vmem:[%s1590_s16 + $0x140] sm:$0xff] %v912_v63  ;;  %1237 = vrsqrt.f32 %v782_v46  ;;  %v562_v16 = vadd.f32 %v561_v23, %v249_v15  ;;  %v250_v32 = vmul.f32 %v1842_v13, %v1842_v13 }
  0xbb   : > { %v251_v18 = vmul.f32 %v1845_v59, %v1845_v59  ;;  %1239 = vrsqrt.f32 %v783_v3  ;;  %v717_v35 = vmul.f32 0.125, %v548_v26  ;;  %v554_v19 = vadd.f32 %v553_v4, %v552_v24  ;;  %v1879_v26 = vld [vmem:[%s1498_s23 + $0x1c0] sm:$0xff] }
  0xbc   : > { %v1232_v42 = vpop.eup %1231  ;;  %v558_v50 = vadd.f32 %v557_v5, %v556_v17  ;;  %v563_v33 = vrot.slane %v562_v16, 2  ;;  %v567_v21 = vrot.slane %v250_v32, 4  ;;  %v252_v29 = vmul.f32 %v1855_v61, %v1855_v61  ;;  %v1874_v17 = vld [vmem:[%s1498_s23 + $0x1b8] sm:$0xff] }
  0xbd   : > { %v913_v20 = vmul.f32 %v1232_v42, %v1774_v55  ;;  %v573_v22 = vrot.slane %v251_v18, 4  ;;  %v784_v0 = vadd.f32 1e-08, %v717_v35  ;;  %v718_v27 = vmul.f32 0.125, %v554_v19 }
  0xbe   : > { %v559_v28 = vrot.slane %v558_v50, 1  ;;  %v564_v30 = vadd.f32 %v563_v33, %v562_v16  ;;  %v568_v47 = vadd.f32 %v567_v21, %v250_v32  ;;  %v253_v25 = vmul.f32 %v1858_v36, %v1858_v36 }
  0xbf   : > { %980 = vst [vmem:[%s1590_s16 + $0x148] sm:$0xff] %v913_v20  ;;  %v574_v51 = vadd.f32 %v573_v22, %v251_v18  ;;  %1241 = vrsqrt.f32 %v784_v0  ;;  %v785_v55 = vadd.f32 1e-08, %v718_v27  ;;  %v579_v34 = vrot.slane %v252_v29, 4  ;;  %v1890_v0 = vld [vmem:[%s1498_s23 + $0x1c8] sm:$0xff] }
  0xc0   : > { %v560_v38 = vadd.f32 %v559_v28, %v558_v50  ;;  %v565_v53 = vrot.slane %v564_v30, 1  ;;  %v569_v2 = vrot.slane %v568_v47, 2  ;;  %v585_v39 = vrot.slane %v253_v25, 4 }
  0xc1   : > { %v575_v12 = vrot.slane %v574_v51, 2  ;;  %1243 = vrsqrt.f32 %v785_v55  ;;  %v580_v40 = vadd.f32 %v579_v34, %v252_v29  ;;  %v254_v6 = vmul.f32 %v1867_v11, %v1867_v11  ;;  %v1894_v34 = vld [vmem:[%s1498_s23 + $0x1d0] sm:$0xff] }
  0xc2   : > { %v719_v57 = vmul.f32 0.125, %v560_v38  ;;  %v1234_v41 = vpop.eup %1233  ;;  %v566_v7 = vadd.f32 %v565_v53, %v564_v30  ;;  %v570_v62 = vadd.f32 %v569_v2, %v568_v47  ;;  %v586_v45 = vadd.f32 %v585_v39, %v253_v25 }
  0xc3   : > { %v576_v60 = vadd.f32 %v575_v12, %v574_v51  ;;  %v1236_v8 = vpop.eup %1235  ;;  %v914_v15 = vmul.f32 %v1234_v41, %v1788_v1  ;;  %v581_v10 = vrot.slane %v580_v40, 2  ;;  %v591_v48 = vrot.slane %v254_v6, 4 }
  0xc4   : > { %v786_v9 = vadd.f32 1e-08, %v719_v57  ;;  %v1238_v14 = vpop.eup %1237  ;;  %v915_v54 = vmul.f32 %v1236_v8, %v1791_v56  ;;  %v720_v46 = vmul.f32 0.125, %v566_v7  ;;  %v571_v58 = vrot.slane %v570_v62, 1 }
  0xc5   : > { %v577_v24 = vrot.slane %v576_v60, 1  ;;  %v1240_v63 = vpop.eup %1239  ;;  %981 = vst [vmem:[%s1590_s16 + $0x150] sm:$0xff] %v914_v15  ;;  %v916_v3 = vmul.f32 %v1238_v14, %v1796_v31  ;;  %v582_v1 = vadd.f32 %v581_v10, %v580_v40  ;;  %v587_v23 = vrot.slane %v586_v45, 2  ;;  %v1909_v15 = vld [vmem:[%s1498_s23 + $0x1e0] sm:$0xff] }
  0xc6   : > { %1245 = vrsqrt.f32 %v786_v9  ;;  %982 = vst [vmem:[%s1590_s16 + $0x158] sm:$0xff] %v915_v54  ;;  %v917_v4 = vmul.f32 %v1240_v63, %v1799_v52  ;;  %v787_v56 = vadd.f32 1e-08, %v720_v46  ;;  %v572_v5 = vadd.f32 %v571_v58, %v570_v62 }
  0xc7   : > { %v578_v16 = vadd.f32 %v577_v24, %v576_v60  ;;  %983 = vst [vmem:[%s1590_s16 + $0x160] sm:$0xff] %v916_v3  ;;  %v583_v32 = vrot.slane %v582_v1, 1  ;;  %v588_v18 = vadd.f32 %v587_v23, %v586_v45  ;;  %v592_v42 = vadd.f32 %v591_v48, %v254_v6 }
  0xc8   : > { %v255_v35 = vmul.f32 %v1874_v17, %v1874_v17  ;;  %984 = vst [vmem:[%s1590_s16 + $0x168] sm:$0xff] %v917_v4  ;;  %1247 = vrsqrt.f32 %v787_v56  ;;  %v721_v31 = vmul.f32 0.125, %v572_v5  ;;  %v256_v50 = vmul.f32 %v1879_v26, %v1879_v26  ;;  %v1916_v4 = vld [vmem:[%s1498_s23 + $0x1e8] sm:$0xff] }
  0xc9   : > { %v722_v19 = vmul.f32 0.125, %v578_v16  ;;  %v1242_v52 = vpop.eup %1241  ;;  %v584_v20 = vadd.f32 %v583_v32, %v582_v1  ;;  %v589_v33 = vrot.slane %v588_v18, 1  ;;  %v593_v21 = vrot.slane %v592_v42, 2 }
  0xca   : > { %v597_v22 = vrot.slane %v255_v35, 4  ;;  %v918_v27 = vmul.f32 %v1242_v52, %v1811_v49  ;;  %v788_v28 = vadd.f32 1e-08, %v721_v31  ;;  %v603_v30 = vrot.slane %v256_v50, 4  ;;  %v1901_v49 = vld [vmem:[%s1498_s23 + $0x1d8] sm:$0xff] }
  0xcb   : > { %v789_v29 = vadd.f32 1e-08, %v722_v19  ;;  %v1244_v47 = vpop.eup %1243  ;;  %v723_v51 = vmul.f32 0.125, %v584_v20  ;;  %v590_v25 = vadd.f32 %v589_v33, %v588_v18  ;;  %v594_v55 = vadd.f32 %v593_v21, %v592_v42 }
  0xcc   : > { %v598_v38 = vadd.f32 %v597_v22, %v255_v35  ;;  %985 = vst [vmem:[%s1590_s16 + $0x170] sm:$0xff] %v918_v27  ;;  %v919_v53 = vmul.f32 %v1244_v47, %v1815_v44  ;;  %1249 = vrsqrt.f32 %v788_v28  ;;  %v604_v2 = vadd.f32 %v603_v30, %v256_v50  ;;  %v1924_v47 = vld [vmem:[%s1498_s23 + $0x1f0] sm:$0xff] }
  0xcd   : > { %v257_v12 = vmul.f32 %v1890_v0, %v1890_v0  ;;  %1251 = vrsqrt.f32 %v789_v29  ;;  %v790_v39 = vadd.f32 1e-08, %v723_v51  ;;  %v724_v57 = vmul.f32 0.125, %v590_v25 }
  0xce   : > { %v595_v40 = vrot.slane %v594_v55, 1  ;;  %986 = vst [vmem:[%s1590_s16 + $0x178] sm:$0xff] %v919_v53  ;;  %v599_v6 = vrot.slane %v598_v38, 2  ;;  %v605_v41 = vrot.slane %v604_v2, 2  ;;  %v258_v62 = vmul.f32 %v1894_v34, %v1894_v34 }
  0xcf   : > { %v609_v7 = vrot.slane %v257_v12, 4  ;;  %1253 = vrsqrt.f32 %v790_v39  ;;  %v791_v60 = vadd.f32 1e-08, %v724_v57  ;;  %v259_v8 = vmul.f32 %v1901_v49, %v1901_v49 }
  0xd0   : > { %v1246_v44 = vpop.eup %1245  ;;  %v596_v45 = vadd.f32 %v595_v40, %v594_v55  ;;  %v600_v10 = vadd.f32 %v599_v6, %v598_v38  ;;  %v606_v48 = vadd.f32 %v605_v41, %v604_v2  ;;  %v615_v46 = vrot.slane %v258_v62, 4 }
  0xd1   : > { %v920_v9 = vmul.f32 %v1246_v44, %v1825_v43  ;;  %v610_v14 = vadd.f32 %v609_v7, %v257_v12  ;;  %1255 = vrsqrt.f32 %v791_v60  ;;  %v621_v58 = vrot.slane %v259_v8, 4  ;;  %v1936_v60 = vld [vmem:[%s1498_s23 + $0x200] sm:$0xff] }
  0xd2   : > { %v725_v54 = vmul.f32 0.125, %v596_v45  ;;  %v1248_v24 = vpop.eup %1247  ;;  %v601_v63 = vrot.slane %v600_v10, 1  ;;  %v607_v3 = vrot.slane %v606_v48, 1  ;;  %v260_v23 = vmul.f32 %v1909_v15, %v1909_v15 }
  0xd3   : > { %987 = vst [vmem:[%s1590_s16 + $0x180] sm:$0xff] %v920_v9  ;;  %v611_v1 = vrot.slane %v610_v14, 2  ;;  %v921_v43 = vmul.f32 %v1248_v24, %v1831_v37  ;;  %v616_v5 = vadd.f32 %v615_v46, %v258_v62  ;;  %v622_v16 = vadd.f32 %v621_v58, %v259_v8 }
  0xd4   : > { %v792_v56 = vadd.f32 1e-08, %v725_v54  ;;  %v602_v32 = vadd.f32 %v601_v63, %v600_v10  ;;  %v608_v18 = vadd.f32 %v607_v3, %v606_v48  ;;  %v627_v35 = vrot.slane %v260_v23, 4  ;;  %v1946_v63 = vld [vmem:[%s1498_s23 + $0x208] sm:$0xff] }
  0xd5   : > { %v612_v42 = vadd.f32 %v611_v1, %v610_v14  ;;  %988 = vst [vmem:[%s1590_s16 + $0x188] sm:$0xff] %v921_v43  ;;  %v617_v31 = vrot.slane %v616_v5, 2  ;;  %v623_v19 = vrot.slane %v622_v16, 2  ;;  %v261_v50 = vmul.f32 %v1916_v4, %v1916_v4 }
  0xd6   : > { %1257 = vrsqrt.f32 %v792_v56  ;;  %v1250_v52 = vpop.eup %1249  ;;  %v726_v20 = vmul.f32 0.125, %v602_v32  ;;  %v727_v33 = vmul.f32 0.125, %v608_v18  ;;  %v628_v21 = vadd.f32 %v627_v35, %v260_v23  ;;  %v1950_v18 = vld [vmem:[%s1498_s23 + $0x210] sm:$0xff] }
  0xd7   : > { %v613_v37 = vrot.slane %v612_v42, 1  ;;  %v1252_v22 = vpop.eup %1251  ;;  %v922_v27 = vmul.f32 %v1250_v52, %v1842_v13  ;;  %v618_v28 = vadd.f32 %v617_v31, %v616_v5  ;;  %v624_v29 = vadd.f32 %v623_v19, %v622_v16 }
  0xd8   : > { %v633_v30 = vrot.slane %v261_v50, 4  ;;  %v923_v51 = vmul.f32 %v1252_v22, %v1845_v59  ;;  %v793_v25 = vadd.f32 1e-08, %v726_v20  ;;  %v794_v55 = vadd.f32 1e-08, %v727_v33  ;;  %v1933_v59 = vld [vmem:[%s1498_s23 + $0x1f8] sm:$0xff] }
  0xd9   : > { %v614_v38 = vadd.f32 %v613_v37, %v612_v42  ;;  %v1254_v53 = vpop.eup %1253  ;;  %989 = vst [vmem:[%s1590_s16 + $0x190] sm:$0xff] %v922_v27  ;;  %v619_v2 = vrot.slane %v618_v28, 1  ;;  %v625_v12 = vrot.slane %v624_v29, 1  ;;  %v629_v39 = vrot.slane %v628_v21, 2 }
  0xda   : > { %v634_v57 = vadd.f32 %v633_v30, %v261_v50  ;;  %990 = vst [vmem:[%s1590_s16 + $0x198] sm:$0xff] %v923_v51  ;;  %v924_v13 = vmul.f32 %v1254_v53, %v1855_v61  ;;  %1259 = vrsqrt.f32 %v793_v25  ;;  %v262_v6 = vmul.f32 %v1924_v47, %v1924_v47 }
  0xdb   : > { %v728_v40 = vmul.f32 0.125, %v614_v38  ;;  %v1256_v41 = vpop.eup %1255  ;;  %1261 = vrsqrt.f32 %v794_v55  ;;  %v620_v7 = vadd.f32 %v619_v2, %v618_v28  ;;  %v626_v62 = vadd.f32 %v625_v12, %v624_v29 }
  0xdc   : > { %v630_v44 = vadd.f32 %v629_v39, %v628_v21  ;;  %991 = vst [vmem:[%s1590_s16 + $0x1a0] sm:$0xff] %v924_v13  ;;  %v925_v45 = vmul.f32 %v1256_v41, %v1858_v36  ;;  %v635_v8 = vrot.slane %v634_v57, 2  ;;  %v639_v9 = vrot.slane %v262_v6, 4 }
  0xdd   : > { %v795_v61 = vadd.f32 1e-08, %v728_v40  ;;  %v729_v10 = vmul.f32 0.125, %v620_v7  ;;  %v730_v48 = vmul.f32 0.125, %v626_v62  ;;  %v263_v54 = vmul.f32 %v1933_v59, %v1933_v59 }
  0xde   : > { %v631_v14 = vrot.slane %v630_v44, 1  ;;  %992 = vst [vmem:[%s1590_s16 + $0x1a8] sm:$0xff] %v925_v45  ;;  %v636_v46 = vadd.f32 %v635_v8, %v634_v57  ;;  %v640_v58 = vadd.f32 %v639_v9, %v262_v6  ;;  %v264_v24 = vmul.f32 %v1936_v60, %v1936_v60 }
  0xdf   : > { %1263 = vrsqrt.f32 %v795_v61  ;;  %v796_v3 = vadd.f32 1e-08, %v729_v10  ;;  %v797_v1 = vadd.f32 1e-08, %v730_v48  ;;  %v645_v43 = vrot.slane %v263_v54, 4 }
  0xe0   : > { %v1258_v36 = vpop.eup %1257  ;;  %v632_v23 = vadd.f32 %v631_v14, %v630_v44  ;;  %v637_v5 = vrot.slane %v636_v46, 1  ;;  %v641_v16 = vrot.slane %v640_v58, 2  ;;  %v651_v32 = vrot.slane %v264_v24, 4 }
  0xe1   : > { %v926_v56 = vmul.f32 %v1258_v36, %v1867_v11  ;;  %1265 = vrsqrt.f32 %v796_v3  ;;  %v646_v35 = vadd.f32 %v645_v43, %v263_v54  ;;  %v265_v31 = vmul.f32 %v1946_v63, %v1946_v63 }
  0xe2   : > { %v731_v42 = vmul.f32 0.125, %v632_v23  ;;  %1267 = vrsqrt.f32 %v797_v1  ;;  %v638_v19 = vadd.f32 %v637_v5, %v636_v46  ;;  %v642_v50 = vadd.f32 %v641_v16, %v640_v58 }
  0xe3   : > { %993 = vst [vmem:[%s1590_s16 + $0x1b0] sm:$0xff] %v926_v56  ;;  %v652_v52 = vadd.f32 %v651_v32, %v264_v24  ;;  %v647_v33 = vrot.slane %v646_v35, 2  ;;  %v657_v37 = vrot.slane %v265_v31, 4  ;;  %v266_v11 = vmul.f32 %v1950_v18, %v1950_v18 }
  0xe4   : > { %v798_v20 = vadd.f32 1e-08, %v731_v42  ;;  %v1260_v21 = vpop.eup %1259  ;;  %v732_v22 = vmul.f32 0.125, %v638_v19  ;;  %v643_v27 = vrot.slane %v642_v50, 1 }
  0xe5   : > { %v653_v28 = vrot.slane %v652_v52, 2  ;;  %v1262_v29 = vpop.eup %1261  ;;  %v927_v30 = vmul.f32 %v1260_v21, %v1874_v17  ;;  %v648_v51 = vadd.f32 %v647_v33, %v646_v35  ;;  %v658_v25 = vadd.f32 %v657_v37, %v265_v31 }
  0xe6   : > { %1269 = vrsqrt.f32 %v798_v20  ;;  %v928_v55 = vmul.f32 %v1262_v29, %v1879_v26  ;;  %v799_v38 = vadd.f32 1e-08, %v732_v22  ;;  %v644_v53 = vadd.f32 %v643_v27, %v642_v50 }
  0xe7   : > { %v654_v2 = vadd.f32 %v653_v28, %v652_v52  ;;  %994 = vst [vmem:[%s1590_s16 + $0x1b8] sm:$0xff] %v927_v30  ;;  %v649_v12 = vrot.slane %v648_v51, 1  ;;  %v659_v39 = vrot.slane %v658_v25, 2  ;;  %v664_v57 = vsel %vm663_vm0, %v266_v11, 0.0 }
  0xe8   : > { %995 = vst [vmem:[%s1590_s16 + $0x1c0] sm:$0xff] %v928_v55  ;;  %1271 = vrsqrt.f32 %v799_v38  ;;  %v733_v40 = vmul.f32 0.125, %v644_v53  ;;  %v665_v17 = vrot.slane %v664_v57, 4 }
  0xe9   : > { %v1264_v13 = vpop.eup %1263  ;;  %v655_v6 = vrot.slane %v654_v2, 1  ;;  %v650_v7 = vadd.f32 %v649_v12, %v648_v51  ;;  %v660_v62 = vadd.f32 %v659_v39, %v658_v25 }
  0xea   : > { %v929_v41 = vmul.f32 %v1264_v13, %v1890_v0  ;;  %v800_v26 = vadd.f32 1e-08, %v733_v40  ;;  %v666_v45 = vadd.f32 %v665_v17, %v664_v57 }
  0xeb   : > { %v656_v44 = vadd.f32 %v655_v6, %v654_v2  ;;  %v1266_v61 = vpop.eup %1265  ;;  %v734_v8 = vmul.f32 0.125, %v650_v7  ;;  %v661_v9 = vrot.slane %v660_v62, 1 }
  0xec   : > { %996 = vst [vmem:[%s1590_s16 + $0x1c8] sm:$0xff] %v929_v41  ;;  %v1268_v10 = vpop.eup %1267  ;;  %v930_v48 = vmul.f32 %v1266_v61, %v1894_v34  ;;  %1273 = vrsqrt.f32 %v800_v26  ;;  %v667_v54 = vrot.slane %v666_v45, 2 }
  0xed   : > { %v735_v14 = vmul.f32 0.125, %v656_v44  ;;  %v931_v0 = vmul.f32 %v1268_v10, %v1901_v49  ;;  %v801_v46 = vadd.f32 1e-08, %v734_v8  ;;  %v662_v58 = vadd.f32 %v661_v9, %v660_v62 }
  0xee   : > { %997 = vst [vmem:[%s1590_s16 + $0x1d0] sm:$0xff] %v930_v48  ;;  %v668_v36 = vadd.f32 %v667_v54, %v666_v45 }
  0xef   : > { %v802_v24 = vadd.f32 1e-08, %v735_v14  ;;  %998 = vst [vmem:[%s1590_s16 + $0x1d8] sm:$0xff] %v931_v0  ;;  %1275 = vrsqrt.f32 %v801_v46  ;;  %v736_v1 = vmul.f32 0.125, %v662_v58 }
  0xf0   : > { %v1270_v3 = vpop.eup %1269  ;;  %v669_v34 = vrot.slane %v668_v36, 1 }
  0xf1   : > { %v932_v23 = vmul.f32 %v1270_v3, %v1909_v15  ;;  %1277 = vrsqrt.f32 %v802_v24  ;;  %v803_v43 = vadd.f32 1e-08, %v736_v1 }
  0xf2   : > { %v1272_v56 = vpop.eup %1271  ;;  %v670_v49 = vadd.f32 %v669_v34, %v668_v36 }
  0xf3   : > { %999 = vst [vmem:[%s1590_s16 + $0x1e0] sm:$0xff] %v932_v23  ;;  %v933_v5 = vmul.f32 %v1272_v56, %v1916_v4  ;;  %1279 = vrsqrt.f32 %v803_v43 }
  0xf4   : > { %v737_v16 = vmul.f32 0.125, %v670_v49 }
  0xf5   : > { %1000 = vst [vmem:[%s1590_s16 + $0x1e8] sm:$0xff] %v933_v5 }
  0xf6   : > { %v1274_v32 = vpop.eup %1273  ;;  %v804_v42 = vadd.f32 1e-08, %v737_v16 }
  0xf7   : > { %v934_v15 = vmul.f32 %v1274_v32, %v1924_v47 }
  0xf8   : > { %1281 = vrsqrt.f32 %v804_v42 }
  0xf9   : > { %v1276_v35 = vpop.eup %1275  ;;  %1001 = vst [vmem:[%s1590_s16 + $0x1f0] sm:$0xff] %v934_v15 }
  0xfa   : > { %v935_v19 = vmul.f32 %v1276_v35, %v1933_v59 }
  0xfb   : > { %v1278_v31 = vpop.eup %1277 }
  0xfc   : > { %v936_v4 = vmul.f32 %v1278_v31, %v1936_v60  ;;  %1002 = vst [vmem:[%s1590_s16 + $0x1f8] sm:$0xff] %v935_v19 }
  0xfd   : > { %v1280_v50 = vpop.eup %1279 }
  0xfe   : > { %1003 = vst [vmem:[%s1590_s16 + $0x200] sm:$0xff] %v936_v4  ;;  %v937_v52 = vmul.f32 %v1280_v50, %v1946_v63 }
 0x100   : > { %1004 = vst [vmem:[%s1590_s16 + $0x208] sm:$0xff] %v937_v52 }
 0x102   : > { %v1282_v47 = vpop.eup %1281 }
 0x103   : > { %v938_v20 = vmul.f32 %v1282_v47, %v1950_v18 }
 0x105   : > { %1005 = vst.msk [vmem:[%s1590_s16 + $0x210] sm:$0xff] %vm663_vm0, %v938_v20 }
 0x106   : > { %1326 = shalt.err (!%p1323_p4)
}
 0x107   : > { %s1327_s4 = scalar_lea.hbm %s1986_s28, 8576  ;;  %s1331_s13 = scalar_lea.hbm %s2033_s1, 17152 }
 0x108   : > { %p1328_p7 = scmp.ne.s32.totalorder %s1986_s28, %s1327_s4  ;;  %p1332_p0 = scmp.lt.u32.totalorder %s1986_s28, %s2033_s1 }
 0x109   : > { %p1333_p1 = scmp.lt.u32.totalorder %s1331_s13, %s1327_s4  ;;  %p1335_p6 = scmp.lt.u32.totalorder %s1327_s4, %s1986_s28 }
 0x10a   : > { %p1329_p8 = pnand %p1328_p7, %p2041_p11 }
 0x10b   : > { %p1334_p3 = por %p1333_p1, %p1332_p0 }
 0x10c   : > { %p1330_p9 = pneg %p1329_p8 }
 0x10d   : > { %p1336_p12 = por %p1335_p6, %p1334_p3 }
 0x10f   : > { %p1337_p13 = pnand %p1336_p12, %p1330_p9 }
 0x111   : > { %1340 = shalt.err (!%p1337_p13)
}
 0x112   : > { %1105 = dma.vmem_to_hbm [thread:$0]  (%p2041_p11), %s1988_s25, 8576, %s1986_s28, %s1007_s29  }
 0x113 PF: > { %s1033_s20 = sand.u32 1, %s1367_s6   ;;  %p2042_p5 = scmp.ne.s32.totalorder %s2037_s18, 0 }
 0x114   : > { %p2043_p10 = scmp.ge.s32.totalorder %s1379_s9, 2  ;;  %s1034_s21 = scalar_lea.sflag [#allocation4], %s1033_s20 }
 0x116   : > { %p1112_p2 = pnand %p2043_p10, %p2042_p5 }
 0x118   : > { %1362 = dma.done.wait (!%p1112_p2), %s1034_s21, 8576  }
 0x119   : > { %1364 = vsyncadd (!%p1112_p2), %s1034_s21, 4294958720  ;;  %p14_p4 = scmp.ge.s32.totalorder %s1418_s12, 4   ;;  %s2044_s6 = smov %s1371_s7 }
 0x11a   : > { %s2045_s7 = smov %s1375_s8  ;;  %s2046_s8 = smov %s1430_s15 }
 0x11b   : > { %s2047_s9 = smov %s1418_s12  ;;  %16 = sbr.rel (!%p14_p4) target bundleno = 5 (0x5), region = 69 }
 0x122   :  { %1039 = vsyncpa [#allocation3], 1 }
 0x123   :  { %1041 = vsyncpa [#allocation3 + $0x1], 1 }
 0x124   :  { %1042 = vsyncpa [#allocation4], 1 }
 0x125   :  { %1044 = vsyncpa [#allocation4 + $0x1], 1 }

</bundles_post_ra>
